<compile_context>
chip_gen: v7x
topology: tpu7x:2x2x1
jax: 0.10.0
libtpu: 0.0.40
codegen_flags: <defaults>
</compile_context>

<pallas_src>
import math

import jax
import jax.numpy as jnp
from jax.experimental import pallas as pl
from jax.experimental.pallas import tpu as pltpu


def _round_up(x: int, m: int) -> int:
    return ((x + m - 1) // m) * m


def _time_embed_mlp_kernel(t_ref, freq_ref, phase_ref, w1_ref, b1_ref, w2_ref, b2_ref, o_ref):
    """One batch tile of: sinusoidal-embed(t) -> Linear -> Swish -> Linear.

    t_ref    : (Bt, 1)                    float32 timestep values
    freq_ref : (1, d_model_pad)           float32 inv_freq row (0 in padded lanes)
    phase_ref: (1, d_model_pad)           float32 parity phase row (0 / pi/2)
    w1_ref   : (d_model_pad, dim_pad)     compute dtype (bf16/f32), zero-padded
    b1_ref   : (1, dim_pad)               float32, zero-padded
    w2_ref   : (dim_pad, dim_pad)         compute dtype, zero-padded
    b2_ref   : (1, dim_pad)               float32, zero-padded
    o_ref    : (Bt, dim_pad)              float32
    """
    # --- Sinusoidal embedding: a single EUP sin per element. ---
    # even lane 2k   -> sin(t * f_k)           (phase 0)
    # odd  lane 2k+1 -> sin(t * f_k + pi/2) = cos(t * f_k)
    ang = t_ref[...] * freq_ref[...] + phase_ref[...]        # (Bt, d_model_pad)
    emb = jnp.sin(ang)
    # Any padded lanes hit zero rows of w1 -> contribute exactly 0.

    # --- Linear -> Swish -> Linear.  MXU matmuls in compute dtype, f32 accumulation. ---
    x = emb.astype(w1_ref.dtype)
    h = jnp.dot(x, w1_ref[...], preferred_element_type=jnp.float32) + b1_ref[...]
    h = h * jax.nn.sigmoid(h)                                # Swish kept in f32 (v5e-friendly)
    out = jnp.dot(h.astype(w2_ref.dtype), w2_ref[...],
                  preferred_element_type=jnp.float32) + b2_ref[...]
    o_ref[...] = out.astype(o_ref.dtype)


def make_sinusoidal_table(T: int, d_model: int) -> jnp.ndarray:
    """Reproduces the nn.Embedding.from_pretrained table (used only by the reference)."""
    assert d_model % 2 == 0
    freqs = jnp.exp(-(jnp.arange(0, d_model, 2, dtype=jnp.float32) / d_model)
                    * math.log(10000.0))                       # (d_model//2,)
    pos = jnp.arange(T, dtype=jnp.float32)                     # (T,)
    ang = pos[:, None] * freqs[None, :]                        # (T, d_model//2)
    emb = jnp.stack([jnp.sin(ang), jnp.cos(ang)], axis=-1)     # (T, d_model//2, 2)
    return emb.reshape(T, d_model)                             # (T, d_model)


def init_params(key, d_model: int, dim: int):
    """Xavier-uniform weights, zero biases (matches module.initialize())."""
    k1, k2 = jax.random.split(key)

    def xavier(k, fan_in, fan_out):
        bound = math.sqrt(6.0 / (fan_in + fan_out))
        # stored as (in, out) so the kernel does x @ W  (== x @ W_pt.T)
        return jax.random.uniform(k, (fan_in, fan_out), jnp.float32, -bound, bound)

    w1 = xavier(k1, d_model, dim)
    b1 = jnp.zeros((dim,), jnp.float32)
    w2 = xavier(k2, dim, dim)
    b2 = jnp.zeros((dim,), jnp.float32)
    return w1, b1, w2, b2


def time_embedding(t, w1, b1, w2, b2, *, compute_dtype=jnp.bfloat16, unpad=True):
    """Forward pass of TimeEmbedding.  t: (B,) int32 -> (B, dim) float32.

    With unpad=False the padded (b_pad, dim_pad) output is returned directly so a
    downstream consumer can fuse/elide the slice instead of paying an extra HBM copy.
    """
    d_model, dim = w1.shape
    B = t.shape[0]

    itemsize = jnp.dtype(compute_dtype).itemsize
    granule = 16 if itemsize == 2 else 8          # bf16 packs 16 sublanes; f32 packs 8

    # d_model: sublane dim of w1 / contraction lane -> pad only to the sublane granule.
    d_model_pad = _round_up(d_model, granule)
    # dim: lane / output dim -> keep lane-dense (multiple of 128) for unmasked stores.
    dim_pad = _round_up(dim, 128)

    # Batch tile: up to 256 rows (fills v6e/v7x 256-row MXU, amortizes ~0.35 µs/step),
    # and prefer >= 2 grid steps when B allows so both v7x TensorCores get work.
    bt = min(256, _round_up(B, granule))
    if B > granule and _round_up(B, bt) // bt < 2:
        bt = _round_up(-(-B // 2), granule)       # cdiv(B, 2), sublane-aligned
    b_pad = _round_up(B, bt)
    grid = (b_pad // bt,)

    # Host-side frequency / parity-phase rows (hoisted out of the per-element kernel path).
    lane = jnp.arange(d_model_pad)
    k = (lane // 2).astype(jnp.float32)
    inv_freq = jnp.where(lane < d_model,
                         jnp.exp(-(2.0 * k / float(d_model)) * math.log(10000.0)),
                         0.0).reshape(1, d_model_pad).astype(jnp.float32)
    phase = ((lane % 2).astype(jnp.float32) * (math.pi / 2.0)).reshape(1, d_model_pad)

    # Zero-pad params (padded rows/cols contribute exactly 0) and cast matmul weights.
    w1p = jnp.zeros((d_model_pad, dim_pad), compute_dtype).at[:d_model, :dim].set(
        w1.astype(compute_dtype))
    w2p = jnp.zeros((dim_pad, dim_pad), compute_dtype).at[:dim, :dim].set(
        w2.astype(compute_dtype))
    b1p = jnp.zeros((1, dim_pad), jnp.float32).at[:, :dim].set(b1.reshape(1, dim))
    b2p = jnp.zeros((1, dim_pad), jnp.float32).at[:, :dim].set(b2.reshape(1, dim))

    # Timesteps as a (b_pad, 1) f32 column (no separate XLA gather / embedding lookup).
    t_f = jnp.zeros((b_pad, 1), jnp.float32).at[:B, 0].set(t.astype(jnp.float32))

    # Accurate-ish advisory cost: one sin per embedding element + one sigmoid per hidden element.
    cost = pl.CostEstimate(
        flops=2 * b_pad * d_model_pad * dim_pad + 2 * b_pad * dim_pad * dim_pad,
        transcendentals=b_pad * d_model_pad + b_pad * dim_pad,
        bytes_accessed=(t_f.size * 4
                        + (w1p.size + w2p.size) * itemsize
                        + (b1p.size + b2p.size + inv_freq.size + phase.size) * 4
                        + b_pad * dim_pad * 4),
    )

    # Resident (constant-index) inputs only need a single buffer when they are large.
    resident_kwargs = {}
    resident_buffers = 2
    if dim_pad >= 1024:
        resident_kwargs["pipeline_mode"] = pl.Buffered(1)
        resident_buffers = 1

    # Computed VMEM requirement (+ headroom) instead of hardcoding 64 MiB (all of v7x's VMEM).
    resident_bytes = ((w1p.size + w2p.size) * itemsize
                      + (b1p.size + b2p.size + inv_freq.size + phase.size) * 4)
    streamed_bytes = 2 * (bt * 1 * 4) + 2 * (bt * dim_pad * 4)   # double-buffered t + out tiles
    vmem_limit = min(resident_buffers * resident_bytes + streamed_bytes + (8 << 20), 32 << 20)

    out = pl.pallas_call(
        _time_embed_mlp_kernel,
        out_shape=jax.ShapeDtypeStruct((b_pad, dim_pad), jnp.float32),
        grid_spec=pltpu.PrefetchScalarGridSpec(
            num_scalar_prefetch=0,
            grid=grid,
            in_specs=[
                pl.BlockSpec((bt, 1), lambda i: (i, 0)),                   # t tile: streams
                pl.BlockSpec((1, d_model_pad), lambda i: (0, 0), **resident_kwargs),
                pl.BlockSpec((1, d_model_pad), lambda i: (0, 0), **resident_kwargs),
                pl.BlockSpec((d_model_pad, dim_pad), lambda i: (0, 0), **resident_kwargs),
                pl.BlockSpec((1, dim_pad), lambda i: (0, 0), **resident_kwargs),
                pl.BlockSpec((dim_pad, dim_pad), lambda i: (0, 0), **resident_kwargs),
                pl.BlockSpec((1, dim_pad), lambda i: (0, 0), **resident_kwargs),
            ],
            out_specs=pl.BlockSpec((bt, dim_pad), lambda i: (i, 0)),
        ),
        compiler_params=pltpu.CompilerParams(
            dimension_semantics=("parallel",),   # shard batch tiles across TCs on v7x
            vmem_limit_bytes=vmem_limit,
        ),
        cost_estimate=cost,
    )(t_f, inv_freq, phase, w1p, b1p, w2p, b2p)

    if not unpad:
        return out
    if b_pad == B and dim_pad == dim:
        return out
    return out[:B, :dim]


def _reference(t, emb_table, w1, b1, w2, b2):
    x = jnp.take(emb_table, t, axis=0)
    h = x @ w1 + b1
    h = h * jax.nn.sigmoid(h)
    return h @ w2 + b2


if __name__ == "__main__":
    # Small shapes consistent with the module: T diffusion steps, d_model embed, dim hidden.
    T, d_model, dim = 16, 32, 64
    B = 8

    key = jax.random.PRNGKey(0)
    k_t, k_params = jax.random.split(key)

    emb_table = make_sinusoidal_table(T, d_model)
    w1, b1, w2, b2 = init_params(k_params, d_model, dim)
    t = jax.random.randint(k_t, (B,), 0, T, dtype=jnp.int32)

    ref = _reference(t, emb_table, w1, b1, w2, b2)

    # f32 compute path: exact semantics of the PyTorch module (up to a ulp of sin arg reduction).
    out_f32 = jax.block_until_ready(time_embedding(t, w1, b1, w2, b2,
                                                   compute_dtype=jnp.float32))
    assert out_f32.shape == (B, dim)
    assert jnp.allclose(out_f32, ref, atol=1e-5, rtol=1e-5), "f32 kernel mismatch vs reference"

    # bf16 matmul inputs + f32 accumulation (v6e/v7x fast path); looser tolerance.
    out_bf16 = jax.block_until_ready(time_embedding(t, w1, b1, w2, b2,
                                                    compute_dtype=jnp.bfloat16))
    assert out_bf16.shape == (B, dim)
    assert jnp.allclose(out_bf16, ref, atol=5e-2, rtol=5e-2), "bf16 kernel mismatch vs reference"

    print("KERNEL_OK")
</pallas_src>

<mosaic_0001>
module attributes {stable_mosaic.version = 11 : i64} {
  func.func @_time_embed_mlp_kernel(%arg0: i32, %arg1: memref<8x1xf32, #tpu.memory_space<vmem>>, %arg2: memref<1x32xf32, #tpu.memory_space<vmem>>, %arg3: memref<1x32xf32, #tpu.memory_space<vmem>>, %arg4: memref<32x128xf32, #tpu.memory_space<vmem>>, %arg5: memref<1x128xf32, #tpu.memory_space<vmem>>, %arg6: memref<128x128xf32, #tpu.memory_space<vmem>>, %arg7: memref<1x128xf32, #tpu.memory_space<vmem>>, %arg8: memref<8x128xf32, #tpu.memory_space<vmem>>) attributes {dimension_semantics = [#tpu.dimension_semantics<parallel>], iteration_bounds = array<i64: 1>, scalar_prefetch = 0 : i64, scratch_operands = 0 : i64, tpu.core_type = #tpu.core_type<tc>, window_params = [{transform_indices = @transform_0, window_bounds = array<i64: 8, 1>}, {pipeline_mode = #tpu.pipeline_mode<synchronous>, transform_indices = @transform_1, window_bounds = array<i64: 1, 32>}, {pipeline_mode = #tpu.pipeline_mode<synchronous>, transform_indices = @transform_2, window_bounds = array<i64: 1, 32>}, {pipeline_mode = #tpu.pipeline_mode<synchronous>, transform_indices = @transform_3, window_bounds = array<i64: 32, 128>}, {pipeline_mode = #tpu.pipeline_mode<synchronous>, transform_indices = @transform_4, window_bounds = array<i64: 1, 128>}, {pipeline_mode = #tpu.pipeline_mode<synchronous>, transform_indices = @transform_5, window_bounds = array<i64: 128, 128>}, {pipeline_mode = #tpu.pipeline_mode<synchronous>, transform_indices = @transform_6, window_bounds = array<i64: 1, 128>}, {transform_indices = @transform_7, window_bounds = array<i64: 8, 128>}]} {
    %c0 = arith.constant 0 : index
    %c0_0 = arith.constant 0 : index
    %0 = vector.load %arg1[%c0, %c0_0] : memref<8x1xf32, #tpu.memory_space<vmem>>, vector<8x1xf32>
    %c0_1 = arith.constant 0 : index
    %c0_2 = arith.constant 0 : index
    %1 = vector.load %arg2[%c0_1, %c0_2] : memref<1x32xf32, #tpu.memory_space<vmem>>, vector<1x32xf32>
    %2 = vector.broadcast %0 : vector<8x1xf32> to vector<8x32xf32>
    %3 = vector.broadcast %1 : vector<1x32xf32> to vector<8x32xf32>
    %4 = arith.mulf %2, %3 : vector<8x32xf32>
    %c0_3 = arith.constant 0 : index
    %c0_4 = arith.constant 0 : index
    %5 = vector.load %arg3[%c0_3, %c0_4] : memref<1x32xf32, #tpu.memory_space<vmem>>, vector<1x32xf32>
    %6 = vector.broadcast %5 : vector<1x32xf32> to vector<8x32xf32>
    %7 = arith.addf %4, %6 : vector<8x32xf32>
    %8 = math.sin %7 : vector<8x32xf32>
    %c0_5 = arith.constant 0 : index
    %c0_6 = arith.constant 0 : index
    %9 = vector.load %arg4[%c0_5, %c0_6] : memref<32x128xf32, #tpu.memory_space<vmem>>, vector<32x128xf32>
    %cst = arith.constant dense<0.000000e+00> : vector<8x128xf32>
    %10 = tpu.matmul %8, %9, %cst {dimension_numbers = #tpu.dot_dimension_numbers<[1], [0], [0], [1], [0, 0, 1, 1], [], []>} : vector<8x32xf32>, vector<32x128xf32>, vector<8x128xf32> -> vector<8x128xf32>
    %c0_7 = arith.constant 0 : index
    %c0_8 = arith.constant 0 : index
    %11 = vector.load %arg5[%c0_7, %c0_8] : memref<1x128xf32, #tpu.memory_space<vmem>>, vector<1x128xf32>
    %12 = vector.broadcast %11 : vector<1x128xf32> to vector<8x128xf32>
    %13 = arith.addf %10, %12 : vector<8x128xf32>
    %14 = arith.negf %13 : vector<8x128xf32>
    %15 = math.exp %14 : vector<8x128xf32>
    %cst_9 = arith.constant 1.000000e+00 : f32
    %16 = vector.broadcast %cst_9 : f32 to vector<8x128xf32>
    %17 = arith.addf %16, %15 : vector<8x128xf32>
    %18 = arith.divf %16, %17 : vector<8x128xf32>
    %19 = arith.mulf %13, %18 : vector<8x128xf32>
    %c0_10 = arith.constant 0 : index
    %c0_11 = arith.constant 0 : index
    %20 = vector.load %arg6[%c0_10, %c0_11] : memref<128x128xf32, #tpu.memory_space<vmem>>, vector<128x128xf32>
    %cst_12 = arith.constant dense<0.000000e+00> : vector<8x128xf32>
    %21 = tpu.matmul %19, %20, %cst_12 {dimension_numbers = #tpu.dot_dimension_numbers<[1], [0], [0], [1], [0, 0, 1, 1], [], []>} : vector<8x128xf32>, vector<128x128xf32>, vector<8x128xf32> -> vector<8x128xf32>
    %c0_13 = arith.constant 0 : index
    %c0_14 = arith.constant 0 : index
    %22 = vector.load %arg7[%c0_13, %c0_14] : memref<1x128xf32, #tpu.memory_space<vmem>>, vector<1x128xf32>
    %23 = vector.broadcast %22 : vector<1x128xf32> to vector<8x128xf32>
    %24 = arith.addf %21, %23 : vector<8x128xf32>
    %c0_15 = arith.constant 0 : index
    %c0_16 = arith.constant 0 : index
    %25 = vector.load %arg8[%c0_15, %c0_16] : memref<8x128xf32, #tpu.memory_space<vmem>>, vector<8x128xf32>
    tpu.vector_store %arg8[%c0_15, %c0_16], %24 {strides = array<i32>} : memref<8x128xf32, #tpu.memory_space<vmem>>, vector<8x128xf32>,
    return
  }
  func.func @transform_0(%arg0: i32) -> (i32, i32) {
    %c0_i32 = arith.constant 0 : i32
    %c0_i32_0 = arith.constant 0 : i32
    return %arg0, %c0_i32 : i32, i32
  }
  func.func @transform_1(%arg0: i32) -> (i32, i32) {
    %c0_i32 = arith.constant 0 : i32
    %c0_i32_0 = arith.constant 0 : i32
    %c0_i32_1 = arith.constant 0 : i32
    return %c0_i32, %c0_i32_0 : i32, i32
  }
  func.func @transform_2(%arg0: i32) -> (i32, i32) {
    %c0_i32 = arith.constant 0 : i32
    %c0_i32_0 = arith.constant 0 : i32
    %c0_i32_1 = arith.constant 0 : i32
    return %c0_i32, %c0_i32_0 : i32, i32
  }
  func.func @transform_3(%arg0: i32) -> (i32, i32) {
    %c0_i32 = arith.constant 0 : i32
    %c0_i32_0 = arith.constant 0 : i32
    %c0_i32_1 = arith.constant 0 : i32
    return %c0_i32, %c0_i32_0 : i32, i32
  }
  func.func @transform_4(%arg0: i32) -> (i32, i32) {
    %c0_i32 = arith.constant 0 : i32
    %c0_i32_0 = arith.constant 0 : i32
    %c0_i32_1 = arith.constant 0 : i32
    return %c0_i32, %c0_i32_0 : i32, i32
  }
  func.func @transform_5(%arg0: i32) -> (i32, i32) {
    %c0_i32 = arith.constant 0 : i32
    %c0_i32_0 = arith.constant 0 : i32
    %c0_i32_1 = arith.constant 0 : i32
    return %c0_i32, %c0_i32_0 : i32, i32
  }
  func.func @transform_6(%arg0: i32) -> (i32, i32) {
    %c0_i32 = arith.constant 0 : i32
    %c0_i32_0 = arith.constant 0 : i32
    %c0_i32_1 = arith.constant 0 : i32
    return %c0_i32, %c0_i32_0 : i32, i32
  }
  func.func @transform_7(%arg0: i32) -> (i32, i32) {
    %c0_i32 = arith.constant 0 : i32
    %c0_i32_0 = arith.constant 0 : i32
    return %arg0, %c0_i32 : i32, i32
  }
}

</mosaic_0001>

<bundles_post_ra>
// kernel: tpu_custom_call.1
= control target key start
LH: loop header
LB: loop body
LE: loop exit
PB: predicated region body
PF: predicated region fallthrough
CT: control target
= control target key end

     0   :  { %12 = vsyncpa [#allocation3], 0  ;;  %s728_s0 = inlined_call_operand.vmem [shape: f32[8,1], index: 0, kind: input, shape index: {}]   ;;  %s729_s1 = inlined_call_operand.vmem [shape: f32[1,32], index: 1, kind: input, shape index: {}]   ;;  %s730_s2 = inlined_call_operand.vmem [shape: f32[1,32], index: 2, kind: input, shape index: {}]   ;;  %s731_s3 = inlined_call_operand.hbm [shape: f32[32,128], index: 3, kind: input, shape index: {}]   ;;  %s732_s4 = inlined_call_operand.vmem [shape: f32[1,128], index: 4, kind: input, shape index: {}]   ;;  %s733_s5 = inlined_call_operand.hbm [shape: f32[128,128], index: 5, kind: input, shape index: {}]   ;;  %s734_s6 = inlined_call_operand.vmem [shape: f32[1,128], index: 6, kind: input, shape index: {}]   ;;  %s735_s7 = inlined_call_operand.hbm [shape: f32[8,128], index: 7, kind: output, shape index: {}]  }
   0x1   :  { %13 = vsyncpa [#allocation6], 0 }
   0x2   :  { %14 = vsyncpa [#allocation4], 0  ;;  %s591_s24 = smov [#allocation2]   ;;  %s519_s28 = scalar_lea.hbm %s731_s3, 512 }
   0x3   :  { %s26_s25 = sshll.u32 %s591_s24, 4  ;;  %p520_p0 = scmp.ne.s32.totalorder %s731_s3, %s519_s28  ;;  %s27_s25 = int_to_ptr.vmem [resolvable:$true] %s26_s25 }
   0x4   :  { %p523_p1 = scmp.lt.u32.totalorder %s519_s28, %s731_s3 }
   0x6   :  { %p525_p2 = pnand %p523_p1, %p520_p0 }
   0x8   :  { %528 = shalt.err (!%p525_p2)
}
   0x9   :  { %s529_s10 = scalar_lea.vmem %s27_s25, 512  ;;  %p534_p4 = scmp.lt.s32.totalorder %s27_s25, %s27_s25 }
   0xa   :  { %p530_p3 = scmp.ne.s32.totalorder %s27_s25, %s529_s10  ;;  %p535_p5 = scmp.lt.s32.totalorder %s529_s10, %s529_s10 }
   0xc   :  { %p536_p6 = por %p535_p5, %p534_p4 }
   0xe   :  { %p537_p7 = pnand %p536_p6, %p530_p3 }
  0x10   :  { %540 = shalt.err (!%p537_p7)
}
  0x11   :  { %s592_s11 = smov 128   ;;  %s593_s12 = smov 8  }
  0x12   :  { %32 = dma.hbm_to_vmem [thread:$0]  %s731_s3, 512, %s27_s25, [#allocation3], %s592_s11, %s592_s11, %s593_s12  }
  0x13   :  { %s594_s15 = smov [#allocation5]   ;;  %s541_s19 = scalar_lea.hbm %s733_s5, 2048 }
  0x14   :  { %s40_s16 = sshll.u32 %s594_s15, 4  ;;  %p542_p8 = scmp.ne.s32.totalorder %s733_s5, %s541_s19  ;;  %s41_s16 = int_to_ptr.vmem [resolvable:$true] %s40_s16 }
  0x15   :  { %p545_p9 = scmp.lt.u32.totalorder %s541_s19, %s733_s5 }
  0x17   :  { %p547_p10 = pnand %p545_p9, %p542_p8 }
  0x19   :  { %550 = shalt.err (!%p547_p10)
}
  0x1a   :  { %s551_s24 = scalar_lea.vmem %s41_s16, 2048  ;;  %p556_p12 = scmp.lt.s32.totalorder %s41_s16, %s41_s16 }
  0x1b   :  { %p552_p11 = scmp.ne.s32.totalorder %s41_s16, %s551_s24  ;;  %p557_p13 = scmp.lt.s32.totalorder %s551_s24, %s551_s24 }
  0x1d   :  { %p558_p0 = por %p557_p13, %p556_p12 }
  0x1f   :  { %p559_p1 = pnand %p558_p0, %p552_p11 }
  0x21   :  { %562 = shalt.err (!%p559_p1)
}
  0x22   :  { %46 = dma.hbm_to_vmem [thread:$0]  %s733_s5, 2048, %s41_s16, [#allocation6], %s592_s11, %s592_s11, %s593_s12  }
  0x23   :  { %585 = dma.done.wait [#allocation3], 512  }
  0x24   :  { %586 = vsyncadd [#allocation3], 4294966784 }
  0x25   :  { %587 = dma.done.wait [#allocation6], 2048  }
  0x26   :  { %588 = vsyncadd [#allocation6], 4294965248  ;;  %v595_v0 = vmov 0   ;;  %v55_v1 = vld [vmem:[%s728_s0] sm:$0xff]  ;;  %v182_v3 = vld [vmem:[#allocation2 + $0x8] sm:$0xff]  ;;  %v596_v5 = vmov 0.0|0.0  }
  0x27   :  { %510 = vset.pattern.permute.xlu0 %v595_v0  ;;  %v181_v2 = vld [vmem:[#allocation2] sm:$0xff]  ;;  %v183_v4 = vld [vmem:[#allocation2 + $0x10] sm:$0xff]  ;;  %461 = vmatprep.subr.bf16.mxu0 %v596_v5  ;;  %v184_v7 = vld [vmem:[#allocation2 + $0x18] sm:$0xff]  ;;  %vm597_vm0 = vmmov 0   ;;  %v598_v8 = vmov 0.0   ;;  %vm192_vm13 = vcmask 261120  }
  0x28   :  { %59 = vperm.xlu0 %510, %v55_v1   ;;  %v462_v6 = vpack.c.bf16 %v182_v3, %v181_v2  ;;  %423 = vmatprep.mubr.msk.f32.mxu0 %vm597_vm0, %v598_v8  ;;  %v465_v9 = vpack.c.bf16 %v184_v7, %v183_v4  ;;  %v383_v10 = vld [vmem:[%s729_s1] ss:$0 sm:$0xff]  ;;  %v599_v26 = vmov 2102212464   ;;  %v600_v28 = vmov 920167782  }
  0x29   :  { %467 = vmatprep.subr.bf16.mxu1 %v596_v5  ;;  %458 = vmatprep.mubr.msk.f32.mxu1 %vm597_vm0, %v598_v8  ;;  %v384_v11 = vld [vmem:[%s730_s2] ss:$0 sm:$0xff]  ;;  %v601_v32 = vmov 1326507024   ;;  %v602_v34 = vmov 683565275  }
  0x2a   :  { %463 = vmatpush3.bf16.msra.mxu0 %v462_v6  ;;  %v603_v36 = vmov 2475754826   ;;  %v604_v39 = vmov 2131351028   ;;  %s605_s9 = smov [#allocation7]  }
  0x2b   :  { %464 = vmatprep.subr.bf16.mxu0 %v596_v5  ;;  %s373_s10 = sshll.u32 %s605_s9, 4  ;;  %s374_s10 = int_to_ptr.vmem [resolvable:$true] %s373_s10 }
  0x2c   :  { %p568_p3 = scmp.lt.s32.totalorder %s374_s10, %s374_s10 }
  0x2e   :  { %466 = vmatpush3.bf16.msra.mxu0 %v465_v9 }
  0xa7   :  { %v60_v12 = vpop.permute.xlu0 %59 }
  0xa8   :  { %v68_v13 = vmul.f32 %v383_v10, %v60_v12 }
  0xaa   :  { %v682_v14 = vadd.f32 %v384_v11, %v68_v13 }
  0xac   :  { %v80_v15 = vand.u32 2139095040, %v682_v14  ;;  %v77_v16 = vand.u32 2147483647, %v682_v14  ;;  %vm79_vm8 = vcmp.lt.s32.totalorder %v682_v14, 0  ;;  %vm169_vm14 = vweird.f32 %v682_v14 }
  0xae   :  { %v81_v17 = vshrl.u32 %v80_v15, 23  ;;  %v84_v19 = vand.u32 8388607, %v77_v16  ;;  %vm78_vm9 = vcmp.le.f32.partialorder %v77_v16, 0.7853982 }
  0xb0   :  { %v385_v18 = vadd.s32 4294967169, %v81_v17  ;;  %v85_v22 = vor.u32 8388608, %v84_v19 }
  0xb2   :  { %v87_v20 = vadd.s32 1, %v385_v18  ;;  %v125_v30 = vshll.u32 %v85_v22, 8 }
  0xb4   :  { %vm88_vm1 = vcmp.gt.s32.totalorder %v87_v20, 0 }
  0xb5   :  { %v89_v21 = vsel %vm88_vm1, %v87_v20, 0 }
  0xb6   :  { %v91_v23 = vand.u32 31, %v89_v21  ;;  %v90_v24 = vshrl.u32 %v89_v21, 5 }
  0xb8   :  { %v92_v25 = vsub.s32 32, %v91_v23  ;;  %v103_v27 = vshll.u32 %v599_v26, %v91_v23  ;;  %v106_v29 = vshll.u32 %v600_v28, %v91_v23  ;;  %v94_v35 = vshll.u32 %v602_v34, %v91_v23 }
  0xb9   :  { %v97_v38 = vshll.u32 %v603_v36, %v91_v23  ;;  %v100_v41 = vshll.u32 %v604_v39, %v91_v23  ;;  %vm112_vm2 = vcmp.lt.s32.totalorder %v90_v24, 4  ;;  %vm109_vm3 = vcmp.lt.s32.totalorder %v90_v24, 1 }
  0xba   :  { %v104_v31 = vshrl.u32 %v600_v28, %v92_v25  ;;  %v107_v33 = vshrl.u32 %v601_v32, %v92_v25  ;;  %v95_v37 = vshrl.u32 %v603_v36, %v92_v25  ;;  %v98_v40 = vshrl.u32 %v604_v39, %v92_v25 }
  0xbb   :  { %v101_v42 = vshrl.u32 %v599_v26, %v92_v25  ;;  %v93_v46 = vshrl.u32 %v602_v34, %v92_v25  ;;  %vm110_vm4 = vcmp.lt.s32.totalorder %v90_v24, 2  ;;  %vm111_vm5 = vcmp.lt.s32.totalorder %v90_v24, 3 }
  0xbc   :  { %v105_v43 = vor.u32 %v104_v31, %v103_v27  ;;  %v108_v44 = vor.u32 %v107_v33, %v106_v29  ;;  %v96_v45 = vor.u32 %v95_v37, %v94_v35  ;;  %v99_v47 = vor.u32 %v98_v40, %v97_v38 }
  0xbd   :  { %v102_v48 = vor.u32 %v101_v42, %v100_v41 }
  0xbe   :  { %v118_v49 = vsel %vm112_vm2, %v105_v43, 920167782  ;;  %v122_v50 = vsel %vm112_vm2, %v108_v44, 1326507024  ;;  %v117_v52 = vsel %vm109_vm3, %v96_v45, %v99_v47  ;;  %v113_v55 = vsel %vm109_vm3, %v93_v46, %v96_v45  ;;  %v273_v44 = vld [vmem:[#allocation5] sm:$0xff]  ;;  %v274_v45 = vld [vmem:[#allocation5 + $0x8] sm:$0xff] }
  0xbf   :  { %v114_v51 = vsel %vm112_vm2, %v102_v48, 2102212464  ;;  %v119_v53 = vsel %vm111_vm5, %v102_v48, %v118_v49  ;;  %v121_v54 = vsel %vm109_vm3, %v99_v47, %v102_v48  ;;  %v123_v58 = vsel %vm111_vm5, %v105_v43, %v122_v50  ;;  %v276_v48 = vld [vmem:[#allocation5 + $0x18] sm:$0xff]  ;;  %v277_v50 = vld [vmem:[#allocation5 + $0x20] sm:$0xff] }
  0xc0   :  { %v115_v56 = vsel %vm111_vm5, %v99_v47, %v114_v51  ;;  %v120_v57 = vsel %vm110_vm4, %v117_v52, %v119_v53  ;;  %v124_v59 = vsel %vm110_vm4, %v121_v54, %v123_v58  ;;  %v468_v46 = vpack.c.bf16 %v274_v45, %v273_v44  ;;  %v275_v47 = vld [vmem:[#allocation5 + $0x10] sm:$0xff]  ;;  %v278_v51 = vld [vmem:[#allocation5 + $0x28] sm:$0xff]  ;;  %v280_v53 = vld [vmem:[#allocation5 + $0x38] sm:$0xff] }
  0xc1   :  { %v688_v60 = vmul.u32.u64.low %v125_v30, %v120_v57  ;;  %v689_v61 = vmul.u32.u64.high %v125_v30, %v120_v57, %v688_v60  ;;  %v691_v62 = vmul.u32.u64.low %v125_v30, %v124_v59  ;;  %v692_v63 = vmul.u32.u64.high %v125_v30, %v124_v59, %v691_v62  ;;  %v283_v58 = vld [vmem:[#allocation5 + $0x50] sm:$0xff]  ;;  %v284_v59 = vld [vmem:[#allocation5 + $0x58] sm:$0xff] }
  0xc2   :  { %v116_v0 = vsel %vm110_vm4, %v113_v55, %v115_v56  ;;  %469 = vmatpush3.bf16.msra.mxu1 %v468_v46  ;;  %v471_v49 = vpack.c.bf16 %v276_v48, %v275_v47  ;;  %v474_v52 = vpack.c.bf16 %v278_v51, %v277_v50  ;;  %v281_v55 = vld [vmem:[#allocation5 + $0x40] sm:$0xff]  ;;  %v282_v56 = vld [vmem:[#allocation5 + $0x48] sm:$0xff] }
  0xc3   :  { %v135_v1 = vadd.s32 1, %v689_v61  ;;  %v132_v2 = vmul.u32 %v125_v30, %v116_v0  ;;  %vm134_vm6 = vc.u32 %v692_v63, %v688_v60  ;;  %v133_v17 = vadd.s32 %v688_v60, %v692_v63  ;;  %470 = vmatprep.subr.bf16.mxu1 %v596_v5  ;;  %v286_v62 = vld [vmem:[#allocation5 + $0x68] sm:$0xff]  ;;  %v287_v0 = vld [vmem:[#allocation5 + $0x70] sm:$0xff] }
  0xc4   :  { %v480_v57 = vpack.c.bf16 %v282_v56, %v281_v55  ;;  %v483_v60 = vpack.c.bf16 %v284_v59, %v283_v58 }
  0xc5   :  { %v136_v3 = vsel %vm134_vm6, %v135_v1, %v689_v61  ;;  %v285_v61 = vld [vmem:[#allocation5 + $0x60] sm:$0xff]  ;;  %v288_v1 = vld [vmem:[#allocation5 + $0x78] sm:$0xff] }
  0xc6   :  { %v137_v4 = vadd.s32 %v136_v3, %v132_v2  ;;  %472 = vmatpush3.bf16.msra.mxu1 %v471_v49  ;;  %v486_v63 = vpack.c.bf16 %v286_v62, %v285_v61  ;;  %v489_v2 = vpack.c.bf16 %v288_v1, %v287_v0  ;;  %v389_v3 = vld [vmem:[%s732_s4] ss:$0 sm:$0xff]  ;;  %s563_s4 = scalar_lea.vmem %s374_s10, 128 }
  0xc7   :  { %473 = vmatprep.subr.bf16.mxu1 %v596_v5  ;;  %p564_p2 = scmp.ne.s32.totalorder %s374_s10, %s563_s4  ;;  %p569_p4 = scmp.lt.s32.totalorder %s563_s4, %s563_s4 }
  0xc8   :  { %v138_v6 = vadd.s32 536870912, %v137_v4 }
  0xc9   :  { %p570_p5 = por %p569_p4, %p568_p3 }
  0xca   :  { %v139_v7 = vshrl.u32 %v138_v6, 30  ;;  %475 = vmatpush3.bf16.msra.mxu1 %v474_v52 }
  0xcb   :  { %476 = vmatprep.subr.bf16.mxu1 %v596_v5  ;;  %p571_p6 = pnand %p570_p5, %p564_p2 }
  0xcc   :  { %v140_v8 = vshll.u32 %v139_v7, 30  ;;  %v163_v29 = vsub.s32 4, %v139_v7 }
  0xce   :  { %v141_v9 = vsub.s32 %v137_v4, %v140_v8  ;;  %v164_v32 = vsel %vm79_vm8, %v163_v29, %v139_v7 }
  0xcf   :  { %v166_v34 = vsel %vm78_vm9, 0, %v164_v32 }
  0xd0   :  { %v143_v10 = vsub.s32 0, %v141_v9  ;;  %v170_v35 = vadd.s32 3, %v166_v34 }
  0xd2   :  { %v386_v11 = vmin.u32 %v143_v10, %v141_v9  ;;  %v171_v36 = vand.u32 3, %v170_v35 }
  0xd4   :  { %v145_v12 = vclz %v386_v11  ;;  %vm176_vm10 = vcmp.eq.s32.totalorder %v171_v36, 2  ;;  %vm173_vm11 = vcmp.eq.s32.totalorder %v171_v36, 0  ;;  %vm172_vm12 = vcmp.lt.s32.totalorder %v171_v36, 2 }
  0xd6   :  { %v387_v13 = vadd.s32 4294967294, %v145_v12 }
  0xd8   :  { %vm388_vm7 = vcmp.lt.s32.totalorder %v387_v13, 0 }
  0xd9   :  { %v148_v15 = vsel %vm388_vm7, 0, %v387_v13 }
  0xda   :  { %v149_v18 = vsub.s32 32, %v148_v15  ;;  %v153_v19 = vsub.s32 4294967266, %v148_v15  ;;  %v150_v20 = vshll.u32 %v141_v9, %v148_v15 }
  0xdc   :  { %v151_v21 = vshrl.u32 %v133_v17, %v149_v18  ;;  %v154_v22 = vadd.s32 127, %v153_v19 }
  0xde   :  { %v152_v23 = vor.u32 %v151_v21, %v150_v20  ;;  %v155_v24 = vshll.u32 %v154_v22, 23 }
  0xe0   :  { %v156_v25 = vor.u32 4788187, %v155_v24  ;;  %v159_v27 = vcvt.s32.f32 %v152_v23 }
  0xe2   :  { %v157_v26 = vand.u32 2147483647, %v156_v25 }
  0xe4   :  { %v160_v28 = vmul.f32 %v159_v27, %v157_v26 }
  0xe6   :  { %v161_v30 = vxor.u32 2147483648, %v160_v28 }
  0xe8   :  { %v162_v31 = vsel %vm79_vm8, %v161_v30, %v160_v28 }
  0xe9   :  { %v165_v33 = vsel %vm78_vm9, %v682_v14, %v162_v31  ;;  %v279_v14 = vld [vmem:[#allocation5 + $0x30] sm:$0xff] }
  0xea   :  { %511 = vcosq.f32 %v165_v33  ;;  %v477_v54 = vpack.c.bf16 %v280_v53, %v279_v14 }
  0xeb   :  { %513 = vsinq.f32 %v165_v33 }
  0xec   :  { %478 = vmatpush3.bf16.msra.mxu1 %v477_v54 }
  0xed   :  { %479 = vmatprep.subr.bf16.mxu1 %v596_v5 }
  0xf0   :  { %481 = vmatpush3.bf16.msra.mxu1 %v480_v57 }
  0xf1   :  { %482 = vmatprep.subr.bf16.mxu1 %v596_v5 }
  0xf4   :  { %v512_v37 = vpop.eup %511  ;;  %484 = vmatpush3.bf16.msra.mxu1 %v483_v60 }
  0xf5   :  { %v514_v38 = vpop.eup %513  ;;  %v177_v39 = vxor.u32 2147483648, %v512_v37  ;;  %485 = vmatprep.subr.bf16.mxu1 %v596_v5 }
  0xf6   :  { %v174_v40 = vxor.u32 2147483648, %v514_v38 }
  0xf7   :  { %v178_v41 = vsel %vm176_vm10, %v177_v39, %v514_v38 }
  0xf8   :  { %v175_v42 = vsel %vm173_vm11, %v512_v37, %v174_v40  ;;  %487 = vmatpush3.bf16.msra.mxu1 %v486_v63 }
  0xf9   :  { %v179_v16 = vsel %vm172_vm12, %v175_v42, %v178_v41  ;;  %488 = vmatprep.subr.bf16.mxu1 %v596_v5  ;;  %v392_v5 = vld [vmem:[%s734_s6] ss:$0 sm:$0xff] }
  0xfa   :  { %v180_v43 = vsel %vm169_vm14, nan, %v179_v16 }
  0xfb   :  { %424 = vmatmul.mubr.msk.f32.vlgmr.msra.gmra.mrb[0].mxu0 %vm192_vm13, %v180_v43 }
  0xfc   :  { %490 = vmatpush3.bf16.msra.mxu1 %v489_v2 }
 0x1ce   :  { %v262_v4 = vpop.f32.mrb[0].mxu0 }
 0x1cf   :  { %v263_v6 = vadd.f32 %v389_v3, %v262_v4  ;;  %v425_v7 = vpop.f32.mrb[1].mxu0 }
 0x1d1   :  { %v391_v8 = vmul.f32 -1.442695, %v263_v6 }
 0x1d3   :  { %515 = vpow2.f32 %v391_v8 }
 0x1dd   :  { %v516_v9 = vpop.eup %515 }
 0x1de   :  { %v269_v10 = vadd.f32 1.0, %v516_v9 }
 0x1e0   :  { %517 = vrcp.f32 %v269_v10 }
 0x1ea   :  { %v518_v11 = vpop.eup %517 }
 0x1eb   :  { %v272_v12 = vmul.f32 %v518_v11, %v263_v6 }
 0x1ed   :  { %459 = vmatmul.mubr.f32.vlgmr.msra.gmra.mrb[0].mxu1 %v272_v12 }
 0x2c0   :  { %v362_v13 = vpop.f32.mrb[0].mxu1 }
 0x2c1   :  { %v363_v15 = vadd.f32 %v392_v5, %v362_v13  ;;  %v460_v17 = vpop.f32.mrb[1].mxu1 }
 0x2c3   :  { %366 = vst [vmem:[#allocation7] sm:$0xff] %v363_v15 }
 0x2c4   :  { %574 = shalt.err (!%p571_p6)
}
 0x2c5   :  { %s575_s13 = scalar_lea.hbm %s735_s7, 128 }
 0x2c6   :  { %p576_p7 = scmp.ne.s32.totalorder %s735_s7, %s575_s13  ;;  %p579_p8 = scmp.lt.u32.totalorder %s575_s13, %s735_s7 }
 0x2c8   :  { %p581_p9 = pnand %p579_p8, %p576_p7 }
 0x2ca   :  { %584 = shalt.err (!%p581_p9)
}
 0x2cb   :  { %376 = dma.vmem_to_hbm [thread:$0]  %s374_s10, 128, %s735_s7, [#allocation4]  }
 0x2cc   :  { %589 = dma.done.wait [#allocation4], 128  }
 0x2cd   :  { %590 = vsyncadd [#allocation4], 4294967168 }
 0x2ce   :  { %380 = vsyncpa [#allocation3], 1 }
 0x2cf   :  { %381 = vsyncpa [#allocation6], 1 }
 0x2d0   :  { %382 = vsyncpa [#allocation4], 1 }

</bundles_post_ra>
